<compile_context>
chip_gen: v6e
topology: v6e:2x2x1
jax: 0.10.0
libtpu: 0.0.40
codegen_flags: <defaults>
</compile_context>

<pallas_src>
import functools
import math

import jax
import jax.numpy as jnp
from jax.experimental import pallas as pl
from jax.experimental.pallas import tpu as pltpu


# ----------------------------------------------------------------------------
# VMEM budgeting helpers (generation aware: v5e/v6e 128 MiB, v7x 64 MiB)
# ----------------------------------------------------------------------------
@functools.lru_cache(maxsize=None)
def _vmem_limit_bytes():
    cap = 64 * 1024 * 1024                      # conservative default (v7x)
    try:
        info = pltpu.get_tpu_info()
        cap = int(getattr(info, "vmem_capacity_bytes", cap))
    except Exception:
        pass
    return max(32 * 1024 * 1024, min(int(cap * 0.8), 100 * 1024 * 1024))


def _padded_bytes(shape, itemsize):
    """Bytes of a VMEM buffer with lane (128) / sublane (8) padding."""
    dims = list(shape)
    if len(dims) >= 1:
        dims[-1] = -(-dims[-1] // 128) * 128
    if len(dims) >= 2:
        dims[-2] = -(-dims[-2] // 8) * 8
    n = 1
    for d in dims:
        n *= d
    return n * itemsize


def _attn_vmem_estimate(tq, tk, h, dk, dr, e, cd_size):
    pb = _padded_bytes
    total = 0
    total += 2 * pb((h, tq, dk), cd_size)       # q        (double-buffered)
    total += 2 * pb((tq, h, dr), cd_size)       # q2
    total += 2 * pb((h, dk, tk), cd_size)       # k
    total += 2 * pb((h, tk, dk), cd_size)       # v
    total += 2 * pb((tq, tk, dr), cd_size)      # rel      (dominant stream)
    total += 2 * pb((e, e), cd_size)            # wo (resident; counted x2)
    total += 2 * pb((1, e), 4)                  # bo
    total += 2 * pb((tq, e), 4)                 # output tile
    total += 2 * pb((h, tq, 1), 4)              # m, l scratch
    total += pb((h, tq, dk), 4)                 # acc scratch
    total += pb((tq, e), cd_size)               # output slab scratch
    total += pb((tq, h, tk), 4)                 # f32 score2 temp
    total += 3 * pb((tq, tk), 4)                # f32 s / p temps
    return total


def _pick_attn_tiles(s, h, dk, dr, e, cd_size, vmem_limit):
    """Largest (tq, tk) whose double-buffered footprint fits ~half the budget."""
    budget = vmem_limit // 2
    tq_cands = sorted({s} | {t for t in (512, 256, 128, 64, 32, 16) if t < s},
                      reverse=True)
    tk_cands = sorted({s} | {t for t in (512, 384, 256, 128) if t < s},
                      reverse=True)
    for tq in tq_cands:                          # prioritize large q tiles
        for tk in tk_cands:
            if _attn_vmem_estimate(tq, tk, h, dk, dr, e, cd_size) <= budget:
                return tq, tk
    return tq_cands[-1], tk_cands[-1]            # fallback: smallest tiles


# ----------------------------------------------------------------------------
# Tiled linear kernel: y = x @ Wt + b   (Wt pre-transposed, possibly bf16)
# ----------------------------------------------------------------------------
def _linear_kernel(x_ref, wt_ref, b_ref, o_ref):
    x = x_ref[...].astype(wt_ref.dtype)          # bf16 MXU path when wt is bf16
    y = jnp.dot(x, wt_ref[...], preferred_element_type=jnp.float32)
    o_ref[...] = (y + b_ref[...]).astype(o_ref.dtype)


def linear(x2d, wt, b2d, out_dtype=None, tm=512, tn=2048):
    """x2d: [M, d_in], wt: [d_in, d_out] pre-transposed, b2d: [1, d_out] f32."""
    m, d_in = x2d.shape
    d_out = wt.shape[1]
    if out_dtype is None:
        out_dtype = x2d.dtype
    tm = m if m <= tm else tm                    # 512 is a multiple of 8
    tn = d_out if d_out <= tn else tn            # 2048 is a multiple of 128
    grid = (pl.cdiv(m, tm), pl.cdiv(d_out, tn))
    return pl.pallas_call(
        _linear_kernel,
        out_shape=jax.ShapeDtypeStruct((m, d_out), out_dtype),
        grid=grid,
        in_specs=[
            pl.BlockSpec((tm, d_in), lambda i, j: (i, 0)),
            pl.BlockSpec((d_in, tn), lambda i, j: (0, j)),
            pl.BlockSpec((1, tn), lambda i, j: (0, j)),
        ],
        out_specs=pl.BlockSpec((tm, tn), lambda i, j: (i, j)),
        compiler_params=pltpu.CompilerParams(
            dimension_semantics=("parallel", "parallel"),
            vmem_limit_bytes=_vmem_limit_bytes()),
    )(x2d, wt, b2d)


# ----------------------------------------------------------------------------
# Attention core kernel (flash-style over kv tiles, fused output projection).
#   q_ref  : [1, H, tq, dk]   (pre-scaled by 1/sqrt(dk) via folded weights)
#   q2_ref : [1, tq, H, dr]   (pre-scaled; equals q when d_relation is None)
#   k_ref  : [1, H, dk, tk]   (pre-transposed: no in-kernel K transpose)
#   v_ref  : [1, H, tk, dk]
#   rel_ref: [1, tq, tk, dr]
#   wo_ref : [E, E]  (resident), bo_ref: [1, E]  (resident, f32)
#   o_ref  : [1, tq, E]  lane-dense, already output-projected
# ----------------------------------------------------------------------------
def _rel_attn_kernel(q_ref, q2_ref, k_ref, v_ref, rel_ref, wo_ref, bo_ref,
                     o_ref, m_sc, l_sc, acc_sc, slab_sc,
                     *, num_heads, d_head, seq_kv, block_kv):
    kv_idx = pl.program_id(2)

    @pl.when(kv_idx == 0)
    def _init():
        m_sc[...] = jnp.full_like(m_sc, -jnp.inf)
        l_sc[...] = jnp.zeros_like(l_sc)
        acc_sc[...] = jnp.zeros_like(acc_sc)

    cd = q_ref.dtype
    q = q_ref[0]              # [H, tq, dk]
    k = k_ref[0]              # [H, dk, tk]
    v = v_ref[0]              # [H, tk, dk]
    q2 = q2_ref[0]            # [tq, H, dr]
    rel = rel_ref[0]          # [tq, tk, dr]

    need_mask = (seq_kv % block_kv) != 0
    if need_mask:
        j_cols = jax.lax.broadcasted_iota(jnp.int32, (1, block_kv), 1)
        valid_cols = (kv_idx * block_kv + j_cols) < seq_kv        # [1, tk]
        j_rows = jax.lax.broadcasted_iota(jnp.int32, (block_kv, 1), 0)
        valid_rows = (kv_idx * block_kv + j_rows) < seq_kv        # [tk, 1]

    # score2 for this kv tile: MXU contraction batched over the query index.
    # (natural output layout [tq, H, tk]; the per-head slice below is a small
    #  sublane relayout — total data moved matches a single relayout pass.)
    s2 = jnp.einsum("qhd,qkd->qhk", q2, rel,
                    preferred_element_type=jnp.float32)           # [tq, H, tk]

    for hh in range(num_heads):                                   # static unroll
        v_h = v[hh]                                               # [tk, dk]
        if need_mask:
            v_h = jnp.where(valid_rows, v_h, jnp.zeros_like(v_h))

        # QK^T on the MXU (K already per-head transposed -> no XLU transpose)
        s = jnp.dot(q[hh], k[hh], preferred_element_type=jnp.float32)  # [tq, tk]
        s = s + s2[:, hh, :]
        if need_mask:
            s = jnp.where(valid_cols, s, -1e30)

        m_prev = m_sc[hh]                                         # [tq, 1] f32
        m_new = jnp.maximum(m_prev, jnp.max(s, axis=-1, keepdims=True))
        alpha = jnp.exp(m_prev - m_new)
        p = jnp.exp(s - m_new)                                    # [tq, tk] f32
        l_sc[hh] = alpha * l_sc[hh] + jnp.sum(p, axis=-1, keepdims=True)
        acc_sc[hh] = alpha * acc_sc[hh] + jnp.dot(
            p.astype(cd), v_h, preferred_element_type=jnp.float32)
        m_sc[hh] = m_new

    @pl.when(kv_idx == pl.num_programs(2) - 1)
    def _finalize():
        # normalize each head into the [tq, E] slab, then fused output matmul
        for hh in range(num_heads):
            inv = 1.0 / l_sc[hh]                                  # exact
            slab_sc[:, hh * d_head:(hh + 1) * d_head] = (
                acc_sc[hh] * inv).astype(cd)
        y = jnp.dot(slab_sc[...], wo_ref[...],
                    preferred_element_type=jnp.float32) + bo_ref[...]
        o_ref[0] = y.astype(o_ref.dtype)


def _attention_core(qh, q2h, kh, vh, rel, wo_t, bo, out_dtype):
    n, h, s, dk = qh.shape
    dr = rel.shape[-1]
    e = h * dk
    cd_size = jnp.dtype(qh.dtype).itemsize
    vmem_limit = _vmem_limit_bytes()
    tq, tk = _pick_attn_tiles(s, h, dk, dr, e, cd_size, vmem_limit)
    grid = (n, pl.cdiv(s, tq), pl.cdiv(s, tk))

    kern = functools.partial(_rel_attn_kernel, num_heads=h, d_head=dk,
                             seq_kv=s, block_kv=tk)

    return pl.pallas_call(
        kern,
        out_shape=jax.ShapeDtypeStruct((n, s, e), out_dtype),
        grid=grid,
        in_specs=[
            pl.BlockSpec((1, h, tq, dk), lambda b, iq, ik: (b, 0, iq, 0)),
            pl.BlockSpec((1, tq, h, dr), lambda b, iq, ik: (b, iq, 0, 0)),
            pl.BlockSpec((1, h, dk, tk), lambda b, iq, ik: (b, 0, 0, ik)),
            pl.BlockSpec((1, h, tk, dk), lambda b, iq, ik: (b, 0, ik, 0)),
            pl.BlockSpec((1, tq, tk, dr), lambda b, iq, ik: (b, iq, ik, 0)),
            pl.BlockSpec((e, e), lambda b, iq, ik: (0, 0)),     # wo resident
            pl.BlockSpec((1, e), lambda b, iq, ik: (0, 0)),     # bo resident
        ],
        out_specs=pl.BlockSpec((1, tq, e), lambda b, iq, ik: (b, iq, 0)),
        scratch_shapes=[
            pltpu.VMEM((h, tq, 1), jnp.float32),    # running max
            pltpu.VMEM((h, tq, 1), jnp.float32),    # running denominator
            pltpu.VMEM((h, tq, dk), jnp.float32),   # running numerator
            pltpu.VMEM((tq, e), qh.dtype),          # [tq, E] output slab
        ],
        compiler_params=pltpu.CompilerParams(
            dimension_semantics=("parallel", "parallel", "arbitrary"),
            vmem_limit_bytes=vmem_limit),
    )(qh, q2h, kh, vh, rel, wo_t, bo)


# ----------------------------------------------------------------------------
# Parameter preparation (done ONCE):
#   - pre-transpose weights, store them in the compute dtype
#   - fold 1/sqrt(dk) into the Q path (and the relation path)
#   - fold the relation projection (wr) into the Q projection, per head
#   - build a fused Q|K|V|Q2 weight for the self-attention fast path
# ----------------------------------------------------------------------------
def prepare_params(raw, d_relation=None, compute_dtype=jnp.bfloat16):
    h = raw["num_heads"]
    e = raw["wq"].shape[0]
    assert e % h == 0
    dk = e // h
    scale = 1.0 / math.sqrt(dk)
    cd = compute_dtype

    wq_s = raw["wq"] * scale            # [E, E]  (scale folded into Q path)
    bq_s = raw["bq"] * scale            # [E]

    q_w = [wq_s]
    q_b = [bq_s]
    if d_relation is not None:
        wr, br = raw["wr"], raw["br"]   # [dr, dk], [dr]
        # q2_h = x @ (wr @ wq_s_h).T + (wr @ bq_s_h + scale*br)
        wqr = jnp.concatenate(
            [wr @ wq_s[i * dk:(i + 1) * dk, :] for i in range(h)], axis=0)
        bqr = jnp.concatenate(
            [wr @ bq_s[i * dk:(i + 1) * dk] + scale * br for i in range(h)],
            axis=0)
        q_w.append(wqr)                 # [H*dr, E]
        q_b.append(bqr)                 # [H*dr]

    def pack(ws, bs):
        wt = jnp.concatenate(ws, axis=0).T.astype(cd)              # [E, d_out]
        b = jnp.concatenate(bs, axis=0).reshape(1, -1).astype(jnp.float32)
        return wt, b

    p = dict(num_heads=h, d_relation=d_relation, compute_dtype=cd)
    p["w_q_t"], p["b_q"] = pack(q_w, q_b)                 # cross-attn Q (+Q2)
    p["w_k_t"], p["b_k"] = pack([raw["wk"]], [raw["bk"]])
    p["w_v_t"], p["b_v"] = pack([raw["wv"]], [raw["bv"]])
    p["w_self_t"], p["b_self"] = pack(                    # fused Q|K|V(|Q2)
        [wq_s, raw["wk"], raw["wv"]] + q_w[1:],
        [bq_s, raw["bk"], raw["bv"]] + q_b[1:])
    p["w_o_t"], p["b_o"] = pack([raw["wo"]], [raw["bo"]])
    return p


# ----------------------------------------------------------------------------
# Full module forward (glue = cheap XLA reshapes/casts; compute = Pallas)
# ----------------------------------------------------------------------------
def relative_attention(query, key, value, relation_bias_matrix, params,
                       mask=None, self_attention=None):
    # TODO(synk): `mask`, training dropout and attention capture unimplemented.
    assert mask is None
    n, s, e = query.shape
    h = params["num_heads"]
    dk = e // h
    d_relation = params["d_relation"]
    cd = params["compute_dtype"]
    dq2 = dk if d_relation is None else d_relation
    assert relation_bias_matrix.shape == (n, s, s, dq2)

    if self_attention is None:
        self_attention = (key is query) and (value is query)

    ns = n * s
    if self_attention:
        # Fused Q|K|V(|Q2) projection: x read once, relation proj folded in.
        fused = linear(query.reshape(ns, e), params["w_self_t"],
                       params["b_self"], out_dtype=cd)
        q2d, k2d, v2d = fused[:, :e], fused[:, e:2 * e], fused[:, 2 * e:3 * e]
        q2_2d = q2d if d_relation is None else fused[:, 3 * e:]
    else:
        qx = linear(query.reshape(ns, e), params["w_q_t"], params["b_q"],
                    out_dtype=cd)
        q2d = qx[:, :e]
        q2_2d = q2d if d_relation is None else qx[:, e:]
        k2d = linear(key.reshape(ns, e), params["w_k_t"], params["b_k"],
                     out_dtype=cd)
        v2d = linear(value.reshape(ns, e), params["w_v_t"], params["b_v"],
                     out_dtype=cd)

    # Layouts for the attention core (one fused XLA transpose/cast each):
    #   Q, V : [N, H, S, dk]   head slice = free outer slice
    #   K    : [N, H, dk, S]   QK^T needs no in-kernel transpose, S on lanes
    #   Q2   : [N, S, H, dr]   natural layout for the rel contraction
    qh = q2d.reshape(n, s, h, dk).transpose(0, 2, 1, 3)
    kh = k2d.reshape(n, s, h, dk).transpose(0, 2, 3, 1)
    vh = v2d.reshape(n, s, h, dk).transpose(0, 2, 1, 3)
    q2h = q2_2d.reshape(n, s, h, dq2)
    relc = relation_bias_matrix.astype(cd)       # bf16 rel stream in HBM

    return _attention_core(qh, q2h, kh, vh, relc,
                           params["w_o_t"], params["b_o"], query.dtype)


# ----------------------------------------------------------------------------
# Pure-JAX reference (uses the raw PyTorch-style parameters)
# ----------------------------------------------------------------------------
def reference_forward(query, key, value, rel, raw, d_relation=None):
    n, s, e = query.shape
    h = raw["num_heads"]
    dk = e // h

    def project(x, w, b):
        y = x.reshape(n * s, e) @ w.T + b
        return y.reshape(n, s, h, dk).transpose(0, 2, 1, 3)

    qh = project(query, raw["wq"], raw["bq"])
    kh = project(key, raw["wk"], raw["bk"])
    vh = project(value, raw["wv"], raw["bv"])

    score1 = jnp.einsum("nhid,nhjd->nhij", qh, kh)
    q2 = qh if d_relation is None else qh @ raw["wr"].T + raw["br"]
    score2 = jnp.einsum("nhid,nijd->nhij", q2, rel)
    scores = (score1 + score2) / math.sqrt(dk)
    p = jax.nn.softmax(scores, axis=-1)
    x = jnp.einsum("nhij,nhjd->nhid", p, vh)
    x = x.transpose(0, 2, 1, 3).reshape(n * s, e)
    return (x @ raw["wo"].T + raw["bo"]).reshape(n, s, e)


# ----------------------------------------------------------------------------
if __name__ == "__main__":
    key = jax.random.PRNGKey(0)
    N, S, H, DK = 2, 8, 4, 8
    E = H * DK          # 32
    DR = 16

    keys = jax.random.split(key, 12)

    def init_linear(k, d_out, d_in):
        k1, k2 = jax.random.split(k)
        bound = 1.0 / math.sqrt(d_in)
        w = jax.random.uniform(k1, (d_out, d_in), jnp.float32, -bound, bound)
        b = jax.random.uniform(k2, (d_out,), jnp.float32, -bound, bound)
        return w, b

    wq, bq = init_linear(keys[0], E, E)
    wk, bk = init_linear(keys[1], E, E)
    wv, bv = init_linear(keys[2], E, E)
    wo, bo = init_linear(keys[3], E, E)
    wr, br = init_linear(keys[4], DR, DK)
    raw = dict(num_heads=H, wq=wq, bq=bq, wk=wk, bk=bk, wv=wv, bv=bv,
               wo=wo, bo=bo)
    raw_r = dict(raw, wr=wr, br=br)

    x_self = jax.random.normal(keys[5], (N, S, E), jnp.float32)
    q_in = jax.random.normal(keys[6], (N, S, E), jnp.float32)
    k_in = jax.random.normal(keys[7], (N, S, E), jnp.float32)
    v_in = jax.random.normal(keys[8], (N, S, E), jnp.float32)
    rel_dk = jax.random.normal(keys[9], (N, S, S, DK), jnp.float32)
    rel_dr = jax.random.normal(keys[10], (N, S, S, DR), jnp.float32)

    # ---- Case 1: self-attention (fused QKV), d_relation=None, bf16 streams ----
    p1 = prepare_params(raw, d_relation=None, compute_dtype=jnp.bfloat16)
    out1 = jax.block_until_ready(
        relative_attention(x_self, x_self, x_self, rel_dk, p1))
    ref1 = reference_forward(x_self, x_self, x_self, rel_dk, raw,
                             d_relation=None)
    err1 = float(jnp.max(jnp.abs(out1 - ref1)))
    assert err1 < 1e-1, f"case1 (self, no relation, bf16): max abs err {err1}"

    # ---- Case 2: cross-attention (separate projections), d_relation=16, f32 ----
    p2 = prepare_params(raw_r, d_relation=DR, compute_dtype=jnp.float32)
    out2 = jax.block_until_ready(
        relative_attention(q_in, k_in, v_in, rel_dr, p2))
    ref2 = reference_forward(q_in, k_in, v_in, rel_dr, raw_r, d_relation=DR)
    err2 = float(jnp.max(jnp.abs(out2 - ref2)))
    assert err2 < 5e-2, f"case2 (cross, relation, f32): max abs err {err2}"

    # ---- Case 3: self-attention with fused relation projection, bf16 ----
    p3 = prepare_params(raw_r, d_relation=DR, compute_dtype=jnp.bfloat16)
    out3 = jax.block_until_ready(
        relative_attention(x_self, x_self, x_self, rel_dr, p3))
    ref3 = reference_forward(x_self, x_self, x_self, rel_dr, raw_r,
                             d_relation=DR)
    err3 = float(jnp.max(jnp.abs(out3 - ref3)))
    assert err3 < 1e-1, f"case3 (self, fused relation, bf16): max abs err {err3}"

    print("KERNEL_OK")
</pallas_src>

<mosaic_0001>
module attributes {stable_mosaic.version = 11 : i64} {
  func.func @_linear_kernel(%arg0: i32, %arg1: i32, %arg2: memref<16x32xf32, #tpu.memory_space<vmem>>, %arg3: memref<32x96xbf16, #tpu.memory_space<vmem>>, %arg4: memref<1x96xf32, #tpu.memory_space<vmem>>, %arg5: memref<16x96xbf16, #tpu.memory_space<vmem>>) attributes {dimension_semantics = [#tpu.dimension_semantics<parallel>, #tpu.dimension_semantics<parallel>], iteration_bounds = array<i64: 1, 1>, scalar_prefetch = 0 : i64, scratch_operands = 0 : i64, tpu.core_type = #tpu.core_type<tc>, window_params = [{transform_indices = @transform_0, window_bounds = array<i64: 16, 32>}, {transform_indices = @transform_1, window_bounds = array<i64: 32, 96>}, {transform_indices = @transform_2, window_bounds = array<i64: 1, 96>}, {transform_indices = @transform_3, window_bounds = array<i64: 16, 96>}]} {
    %c0 = arith.constant 0 : index
    %c0_0 = arith.constant 0 : index
    %0 = vector.load %arg2[%c0, %c0_0] : memref<16x32xf32, #tpu.memory_space<vmem>>, vector<16x32xf32>
    %1 = arith.truncf %0 : vector<16x32xf32> to vector<16x32xbf16>
    %c0_1 = arith.constant 0 : index
    %c0_2 = arith.constant 0 : index
    %2 = vector.load %arg3[%c0_1, %c0_2] : memref<32x96xbf16, #tpu.memory_space<vmem>>, vector<32x96xbf16>
    %cst = arith.constant dense<0.000000e+00> : vector<16x96xf32>
    %3 = tpu.matmul %1, %2, %cst {dimension_numbers = #tpu.dot_dimension_numbers<[1], [0], [0], [1], [0, 0, 1, 1], [], []>} : vector<16x32xbf16>, vector<32x96xbf16>, vector<16x96xf32> -> vector<16x96xf32>
    %c0_3 = arith.constant 0 : index
    %c0_4 = arith.constant 0 : index
    %4 = vector.load %arg4[%c0_3, %c0_4] : memref<1x96xf32, #tpu.memory_space<vmem>>, vector<1x96xf32>
    %5 = vector.broadcast %4 : vector<1x96xf32> to vector<16x96xf32>
    %6 = arith.addf %3, %5 : vector<16x96xf32>
    %7 = arith.truncf %6 : vector<16x96xf32> to vector<16x96xbf16>
    %c0_5 = arith.constant 0 : index
    %c0_6 = arith.constant 0 : index
    %8 = vector.load %arg5[%c0_5, %c0_6] : memref<16x96xbf16, #tpu.memory_space<vmem>>, vector<16x96xbf16>
    tpu.vector_store %arg5[%c0_5, %c0_6], %7 {strides = array<i32>} : memref<16x96xbf16, #tpu.memory_space<vmem>>, vector<16x96xbf16>,
    return
  }
  func.func @transform_0(%arg0: i32, %arg1: i32) -> (i32, i32) {
    %c0_i32 = arith.constant 0 : i32
    %c0_i32_0 = arith.constant 0 : i32
    return %arg0, %c0_i32 : i32, i32
  }
  func.func @transform_1(%arg0: i32, %arg1: i32) -> (i32, i32) {
    %c0_i32 = arith.constant 0 : i32
    %c0_i32_0 = arith.constant 0 : i32
    return %c0_i32, %arg1 : i32, i32
  }
  func.func @transform_2(%arg0: i32, %arg1: i32) -> (i32, i32) {
    %c0_i32 = arith.constant 0 : i32
    %c0_i32_0 = arith.constant 0 : i32
    return %c0_i32, %arg1 : i32, i32
  }
  func.func @transform_3(%arg0: i32, %arg1: i32) -> (i32, i32) {
    %c0_i32 = arith.constant 0 : i32
    return %arg0, %arg1 : i32, i32
  }
}

</mosaic_0001>

<bundles_post_ra>
// kernel: tpu_custom_call.1
= control target key start
LH: loop header
LB: loop body
LE: loop exit
PB: predicated region body
PF: predicated region fallthrough
CT: control target
= control target key end

     0   :  { %8 = vsyncpa [#allocation3], 0  ;;  %s287_s0 = inlined_call_operand.hbm [shape: f32[16,32], index: 0, kind: input, shape index: {}]   ;;  %s288_s1 = inlined_call_operand.hbm [shape: bf16[32,96], index: 1, kind: input, shape index: {}]   ;;  %s289_s2 = inlined_call_operand.vmem [shape: f32[1,96], index: 2, kind: input, shape index: {}]   ;;  %s290_s3 = inlined_call_operand.hbm [shape: bf16[16,96], index: 3, kind: output, shape index: {}]  }
   0x1   :  { %9 = vsyncpa [#allocation6], 0 }
   0x2   :  { %10 = vsyncpa [#allocation4], 0  ;;  %s240_s12 = smov [#allocation2]  }
   0x3   :  { %s16_s13 = sshll.u32 %s240_s12, 4  ;;  %s17_s13 = int_to_ptr.vmem [resolvable:$true] %s16_s13 }
   0x4   :  { %s182_s14 = scalar_lea.vmem %s17_s13, 256  ;;  %p187_p1 = scmp.lt.s32.totalorder %s17_s13, %s17_s13 }
   0x5   :  { %p183_p0 = scmp.ne.s32.totalorder %s17_s13, %s182_s14  ;;  %p188_p2 = scmp.lt.s32.totalorder %s182_s14, %s182_s14 }
   0x7   :  { %p189_p3 = por %p188_p2, %p187_p1 }
   0x9   :  { %p190_p4 = pnand %p189_p3, %p183_p0 }
   0xb   :  { %193 = shalt.err (!%p190_p4)
}
   0xc   :  { %s241_s15 = smov 128   ;;  %s242_s16 = smov 8  }
   0xd   :  { %22 = dma.hbm_to_vmem [thread:$0]  %s287_s0, 256, %s17_s13, [#allocation3], %s241_s15, %s241_s15, %s242_s16  }
   0xe   :  { %s243_s19 = smov [#allocation5]  }
   0xf   :  { %s28_s20 = sshll.u32 %s243_s19, 4  ;;  %s29_s20 = int_to_ptr.vmem [resolvable:$true] %s28_s20 }
  0x10   :  { %s202_s21 = scalar_lea.vmem %s29_s20, 256  ;;  %p207_p6 = scmp.lt.s32.totalorder %s29_s20, %s29_s20 }
  0x11   :  { %p203_p5 = scmp.ne.s32.totalorder %s29_s20, %s202_s21  ;;  %p208_p7 = scmp.lt.s32.totalorder %s202_s21, %s202_s21 }
  0x13   :  { %p209_p8 = por %p208_p7, %p207_p6 }
  0x15   :  { %p210_p9 = pnand %p209_p8, %p203_p5 }
  0x17   :  { %213 = shalt.err (!%p210_p9)
}
  0x18   :  { %s244_s22 = smov 64   ;;  %s245_s23 = smov 4  }
  0x19   :  { %34 = dma.hbm_to_vmem [thread:$0]  %s288_s1, 256, %s29_s20, [#allocation6], %s244_s22, %s244_s22, %s245_s23  }
  0x1a   :  { %234 = dma.done.wait [#allocation3], 256  }
  0x1b   :  { %235 = vsyncadd [#allocation3], 4294967040 }
  0x1c   :  { %236 = dma.done.wait [#allocation6], 256  }
  0x1d   :  { %237 = vsyncadd [#allocation6], 4294967040  ;;  %v246_v0 = vmov 0.0   ;;  %vm247_vm0 = vmmov 0   ;;  %v172_v1 = vld [vmem:[#allocation5 + $0x8] sm:$0xff]   ;;  %v173_v2 = vld [vmem:[#allocation5] sm:$0xff]  }
  0x1e   :  { %155 = vmatprep.subr.bf16.mxu0 %v246_v0  ;;  %159 = vmatprep.mubr.msk.bf16.mxu0 %vm247_vm0, %v246_v0  ;;  %v44_v3 = vld [vmem:[#allocation2] sm:$0xff]  ;;  %v45_v4 = vld [vmem:[#allocation2 + $0x8] sm:$0xff]  ;;  %vm70_vm1 = vcmask 261120   ;;  %vm123_vm2 = vcmask 781312   ;;  %s248_s26 = smov [#allocation7]  }
  0x1f   :  { %156 = vmatpush3.bf16.msra.mxu0 %v172_v1  ;;  %v46_v5 = vpack.c.bf16 %v45_v4, %v44_v3  ;;  %v144_v6 = vld [vmem:[%s289_s2] ss:$0 sm:$0xff]  ;;  %s131_s27 = sshll.u32 %s248_s26, 4  ;;  %s132_s27 = int_to_ptr.vmem [resolvable:$true] %s131_s27 }
  0x20   :  { %157 = vmatprep.subr.bf16.mxu0 %v246_v0  ;;  %s214_s28 = scalar_lea.vmem %s132_s27, 128  ;;  %p219_p11 = scmp.lt.s32.totalorder %s132_s27, %s132_s27 }
  0x21   :  { %p215_p10 = scmp.ne.s32.totalorder %s132_s27, %s214_s28  ;;  %p220_p12 = scmp.lt.s32.totalorder %s214_s28, %s214_s28 }
  0x23   :  { %158 = vmatpush3.bf16.msra.mxu0 %v173_v2  ;;  %p221_p13 = por %p220_p12, %p219_p11 }
  0x25   :  { %p222_p0 = pnand %p221_p13, %p215_p10 }
  0x26   :  { %160 = vmatmul.mubr.msk.bf16.vlgmr.msra.gmra.mxu0 %vm70_vm1, %v46_v5 }
  0xe6   :  { %v108_v7 = vpop.f32.mrf.mxu0 }
  0xe7   :  { %v109_v8 = vadd.f32 %v144_v6, %v108_v7 }
  0xe8   :  { %v161_v9 = vpop.f32.mrf.mxu0 }
  0xe9   :  { %v150_v10 = vpack.c.bf16 %v109_v8, %v109_v8 }
  0xea   :  { %v111_v11 = vpop.f32.mrf.mxu0 }
  0xeb   :  { %v112_v12 = vadd.f32 %v144_v6, %v111_v11  ;;  %124 = vst.msk [vmem:[#allocation7] sm:$0xf] %vm123_vm2, %v150_v10 }
  0xec   :  { %v162_v13 = vpop.f32.mrf.mxu0 }
  0xed   :  { %v151_v14 = vpack.c.bf16 %v112_v12, %v112_v12 }
  0xef   :  { %125 = vst.msk [vmem:[#allocation7 + $0x4] sm:$0xf] %vm123_vm2, %v151_v14 }
  0xf0   :  { %225 = shalt.err (!%p222_p0)
}
  0xf1   :  { %137 = dma.vmem_to_hbm [thread:$0]  %s132_s27, 128, %s290_s3, [#allocation4], %s244_s22, %s244_s22, %s245_s23  }
  0xf2   :  { %238 = dma.done.wait [#allocation4], 128  }
  0xf3   :  { %239 = vsyncadd [#allocation4], 4294967168 }
  0xf4   :  { %141 = vsyncpa [#allocation3], 1 }
  0xf5   :  { %142 = vsyncpa [#allocation6], 1 }
  0xf6   :  { %143 = vsyncpa [#allocation4], 1 }

</bundles_post_ra>
